<compile_context>
chip_gen: v7x
topology: tpu7x:2x2x1
jax: 0.10.0
libtpu: 0.0.40
codegen_flags: <defaults>
</compile_context>

<pallas_src>
import functools

import jax
import jax.numpy as jnp
from jax.experimental import pallas as pl
from jax.experimental.pallas import tpu as pltpu

_SUBLANE = 8                 # f32 sublane count
_VMEM_BUDGET = 48 << 20      # conservative vs v7x's 64 MiB physical VMEM


def _round_up(x: int, m: int) -> int:
    return ((x + m - 1) // m) * m


def _pad_width(d: int) -> int:
    # >=128 lanes; 256-multiples once wider than one lane tile (v6e/v7x MXU).
    return 128 if d <= 128 else _round_up(d, 256)


def _mlp_fused_kernel(*refs, num_layers: int, emit_layers: tuple):
    """Fused MLP over one row tile.

    refs = [x, w0, b0, ..., w_{L-1}, b_{L-1}] + [out_l for l in emit_layers]
      x   : (TILE_M, K0) f32 row tile of adj (K0 = true node_num, unpadded)
      w_l : (Kp_l, Np_l) bf16, pre-transposed / zero-padded
      b_l : (1, Np_l)   f32
    The layer loop is unrolled at trace time; the running activation lives in
    vregs/VMEM managed by the compiler.  Zero-padded weight K-rows make the
    padded activation columns irrelevant to the next contraction.
    """
    x_ref = refs[0]
    out_refs = refs[1 + 2 * num_layers:]

    s = x_ref[...]                                   # f32 (TILE_M, K0)
    out_i = 0
    for l in range(num_layers):
        w = refs[1 + 2 * l][...]                     # (Kp, Np) bf16
        b = refs[2 + 2 * l][...]                     # (1, Np)  f32
        s = jax.lax.dot_general(                     # MXU: bf16 x bf16 -> f32
            s.astype(jnp.bfloat16), w,
            dimension_numbers=(((1,), (0,)), ((), ())),
            preferred_element_type=jnp.float32,
        )
        s = s + b                                    # f32 epilogue (v5e-safe)
        if l != num_layers - 1:
            s = jnp.maximum(s, 0.0)
            # TODO(synk): training-mode dropout (pltpu.prng_*) not implemented;
            # eval semantics (identity) are used.
        if l in emit_layers:
            o = out_refs[out_i]
            # store only the true feature columns (no padded writeback)
            o[...] = s[:, :o.shape[1]].astype(o.dtype)
            out_i += 1


def prepare_mlp_a_params(params):
    """One-time host-side prep of the static Linear params.

    PyTorch (out,in) weights -> transposed (in,out), zero-padded to
    MXU-friendly widths, cast to bf16; biases -> (1, out_pad) f32.
    Returns [(w_t_padded, b_padded, out_dim_true), ...].  Call once, reuse.
    """
    prepared = []
    for l, (w, b) in enumerate(params):
        n, k = w.shape                               # PyTorch (out, in)
        kp = k if l == 0 else _pad_width(k)          # layer-0 K matches raw adj
        np_ = _pad_width(n)
        wt = jnp.pad(w.astype(jnp.bfloat16).T, ((0, kp - k), (0, np_ - n)))
        bp = jnp.pad(b.astype(jnp.float32).reshape(1, n), ((0, 0), (0, np_ - n)))
        prepared.append((wt, bp, n))
    return prepared


def _choose_tile_m(M, k0, prepared, emit_layers):
    """Largest row tile whose (conservatively double-buffered) VMEM footprint
    fits the budget; weights/biases stay resident across the whole grid."""
    resident = sum(2 * (wt.size * 2 + bp.size * 4) for (wt, bp, _) in prepared)
    max_np = max(wt.shape[1] for (wt, _, _) in prepared)

    def est(tm):
        v = resident
        v += 2 * tm * k0 * 4                                     # adj tile
        v += sum(2 * tm * prepared[l][2] * 4 for l in emit_layers)  # out tiles
        v += 2 * tm * max_np * 4                                 # live act + headroom
        return v

    tile_m = min(256, _round_up(M, _SUBLANE))
    while tile_m > _SUBLANE and est(tile_m) > _VMEM_BUDGET:
        tile_m = max(_SUBLANE, _round_up(tile_m // 2, _SUBLANE))
    return tile_m, _round_up(M, tile_m), est(tile_m)


def mlp_a_forward(adj, prepared_params, *, return_intermediates=True):
    """Matches MLP_A.forward: returns (s_list, s).  Dropout in eval mode.
    With return_intermediates=False only the final layer is written back."""
    num_layers = len(prepared_params)
    M, K0 = adj.shape
    assert K0 == prepared_params[0][0].shape[0], "adj width must equal node_num"

    emit_layers = tuple(range(num_layers)) if return_intermediates \
        else (num_layers - 1,)

    tile_m, Mp, est_bytes = _choose_tile_m(M, K0, prepared_params, emit_layers)
    vmem_limit = int(min(max(2 * est_bytes, 16 << 20), _VMEM_BUDGET))

    x = adj.astype(jnp.float32)
    if Mp != M:                                      # row-pad only when needed
        x = jnp.pad(x, ((0, Mp - M), (0, 0)))

    flat_inputs = [x]
    in_specs = [pl.BlockSpec((tile_m, K0), lambda i: (i, 0))]    # streamed
    for (wt, bp, _) in prepared_params:
        flat_inputs += [wt, bp]
        in_specs += [pl.BlockSpec(wt.shape, lambda i: (0, 0)),   # resident
                     pl.BlockSpec(bp.shape, lambda i: (0, 0))]   # resident

    out_shape = tuple(
        jax.ShapeDtypeStruct((Mp, prepared_params[l][2]), jnp.float32)
        for l in emit_layers)
    out_specs = tuple(
        pl.BlockSpec((tile_m, prepared_params[l][2]), lambda i: (i, 0))
        for l in emit_layers)

    flops = sum(2 * Mp * wt.shape[0] * wt.shape[1]
                for (wt, _, _) in prepared_params)
    bytes_accessed = (x.size * 4
                      + sum(wt.size * 2 + bp.size * 4
                            for (wt, bp, _) in prepared_params)
                      + sum(Mp * prepared_params[l][2] * 4 for l in emit_layers))

    kernel = functools.partial(_mlp_fused_kernel,
                               num_layers=num_layers, emit_layers=emit_layers)
    outs = pl.pallas_call(
        kernel,
        out_shape=out_shape,
        grid=(Mp // tile_m,),
        in_specs=in_specs,
        out_specs=out_specs,
        compiler_params=pltpu.CompilerParams(
            dimension_semantics=("parallel",),       # 2 TCs on v7x
            vmem_limit_bytes=vmem_limit),
        cost_estimate=pl.CostEstimate(
            flops=flops, transcendentals=0, bytes_accessed=bytes_accessed),
    )(*flat_inputs)

    if not isinstance(outs, (list, tuple)):
        outs = (outs,)
    outs = [o[:M] for o in outs]                     # drop padded rows only
    s = outs[-1]
    s_list = list(outs) if return_intermediates else [s]
    return s_list, s


def init_mlp_a_params(key, num_layers, node_num, hidden_dim, output_dim):
    """Deterministic init mimicking nn.Linear's uniform(-1/sqrt(fan_in), ...)."""
    if num_layers == 1:
        dims = [(node_num, output_dim)]
    else:
        dims = [(node_num, hidden_dim)]
        dims += [(hidden_dim, hidden_dim)] * (num_layers - 2)
        dims += [(hidden_dim, output_dim)]

    params = []
    for (fan_in, fan_out) in dims:
        key, kw, kb = jax.random.split(key, 3)
        bound = 1.0 / (fan_in ** 0.5)
        w = jax.random.uniform(kw, (fan_out, fan_in), jnp.float32, -bound, bound)
        b = jax.random.uniform(kb, (fan_out,), jnp.float32, -bound, bound)
        params.append((w, b))
    return params


if __name__ == "__main__":
    # Small shapes consistent with the module: adj is (node_num, node_num).
    num_layers = 3
    node_num = 16
    hidden_dim = 32
    output_dim = 8
    dropout_ratio = 0.5  # identity at inference

    key = jax.random.PRNGKey(0)
    key, kx = jax.random.split(key)
    adj = jax.random.normal(kx, (node_num, node_num), jnp.float32)

    params = init_mlp_a_params(key, num_layers, node_num, hidden_dim, output_dim)
    prepared = prepare_mlp_a_params(params)          # one-time static prep

    s_list, s = mlp_a_forward(adj, prepared)
    jax.block_until_ready(s)
    for t in s_list:
        jax.block_until_ready(t)

    # Reference matching the kernel's numerics (bf16 matmul, f32 accumulation,
    # f32 bias/ReLU).  Tolerance loosened per review since matmuls are bf16.
    ref = adj
    ref_list = []
    for l, (w, b) in enumerate(params):
        ref = jax.lax.dot_general(
            ref.astype(jnp.bfloat16), w.T.astype(jnp.bfloat16),
            dimension_numbers=(((1,), (0,)), ((), ())),
            preferred_element_type=jnp.float32) + b
        if l != num_layers - 1:
            ref = jnp.maximum(ref, 0.0)
        ref_list.append(ref)

    assert s.shape == (node_num, output_dim)
    assert len(s_list) == num_layers
    for l in range(num_layers):
        assert s_list[l].shape == ref_list[l].shape
        assert jnp.allclose(s_list[l], ref_list[l], atol=1e-2, rtol=1e-2)
    assert jnp.allclose(s, ref_list[-1], atol=1e-2, rtol=1e-2)

    print("KERNEL_OK")
</pallas_src>

<mosaic_0001>
module attributes {stable_mosaic.version = 11 : i64} {
  func.func @_mlp_fused_kernel(%arg0: i32, %arg1: memref<16x16xf32, #tpu.memory_space<vmem>>, %arg2: memref<16x128xbf16, #tpu.memory_space<vmem>>, %arg3: memref<1x128xf32, #tpu.memory_space<vmem>>, %arg4: memref<128x128xbf16, #tpu.memory_space<vmem>>, %arg5: memref<1x128xf32, #tpu.memory_space<vmem>>, %arg6: memref<128x128xbf16, #tpu.memory_space<vmem>>, %arg7: memref<1x128xf32, #tpu.memory_space<vmem>>, %arg8: memref<16x32xf32, #tpu.memory_space<vmem>>, %arg9: memref<16x32xf32, #tpu.memory_space<vmem>>, %arg10: memref<16x8xf32, #tpu.memory_space<vmem>>) attributes {dimension_semantics = [#tpu.dimension_semantics<parallel>], iteration_bounds = array<i64: 1>, scalar_prefetch = 0 : i64, scratch_operands = 0 : i64, tpu.core_type = #tpu.core_type<tc>, window_params = [{transform_indices = @transform_0, window_bounds = array<i64: 16, 16>}, {pipeline_mode = #tpu.pipeline_mode<synchronous>, transform_indices = @transform_1, window_bounds = array<i64: 16, 128>}, {pipeline_mode = #tpu.pipeline_mode<synchronous>, transform_indices = @transform_2, window_bounds = array<i64: 1, 128>}, {pipeline_mode = #tpu.pipeline_mode<synchronous>, transform_indices = @transform_3, window_bounds = array<i64: 128, 128>}, {pipeline_mode = #tpu.pipeline_mode<synchronous>, transform_indices = @transform_4, window_bounds = array<i64: 1, 128>}, {pipeline_mode = #tpu.pipeline_mode<synchronous>, transform_indices = @transform_5, window_bounds = array<i64: 128, 128>}, {pipeline_mode = #tpu.pipeline_mode<synchronous>, transform_indices = @transform_6, window_bounds = array<i64: 1, 128>}, {transform_indices = @transform_7, window_bounds = array<i64: 16, 32>}, {transform_indices = @transform_8, window_bounds = array<i64: 16, 32>}, {transform_indices = @transform_9, window_bounds = array<i64: 16, 8>}]} {
    %c0 = arith.constant 0 : index
    %c0_0 = arith.constant 0 : index
    %0 = vector.load %arg1[%c0, %c0_0] : memref<16x16xf32, #tpu.memory_space<vmem>>, vector<16x16xf32>
    %c0_1 = arith.constant 0 : index
    %c0_2 = arith.constant 0 : index
    %1 = vector.load %arg2[%c0_1, %c0_2] : memref<16x128xbf16, #tpu.memory_space<vmem>>, vector<16x128xbf16>
    %c0_3 = arith.constant 0 : index
    %c0_4 = arith.constant 0 : index
    %2 = vector.load %arg3[%c0_3, %c0_4] : memref<1x128xf32, #tpu.memory_space<vmem>>, vector<1x128xf32>
    %3 = arith.truncf %0 : vector<16x16xf32> to vector<16x16xbf16>
    %cst = arith.constant dense<0.000000e+00> : vector<16x128xf32>
    %4 = tpu.matmul %3, %1, %cst {dimension_numbers = #tpu.dot_dimension_numbers<[1], [0], [0], [1], [0, 0, 1, 1], [], []>} : vector<16x16xbf16>, vector<16x128xbf16>, vector<16x128xf32> -> vector<16x128xf32>
    %5 = vector.broadcast %2 : vector<1x128xf32> to vector<16x128xf32>
    %6 = arith.addf %4, %5 : vector<16x128xf32>
    %cst_5 = arith.constant 0.000000e+00 : f32
    %7 = vector.broadcast %cst_5 : f32 to vector<16x128xf32>
    %8 = arith.maximumf %6, %7 : vector<16x128xf32>
    %9 = vector.extract_strided_slice %8 {offsets = [0, 0], sizes = [16, 32], strides = [1, 1]} : vector<16x128xf32> to vector<16x32xf32>
    %c0_6 = arith.constant 0 : index
    %c0_7 = arith.constant 0 : index
    %10 = vector.load %arg8[%c0_6, %c0_7] : memref<16x32xf32, #tpu.memory_space<vmem>>, vector<16x32xf32>
    tpu.vector_store %arg8[%c0_6, %c0_7], %9 {strides = array<i32>} : memref<16x32xf32, #tpu.memory_space<vmem>>, vector<16x32xf32>,
    %c0_8 = arith.constant 0 : index
    %c0_9 = arith.constant 0 : index
    %11 = vector.load %arg4[%c0_8, %c0_9] : memref<128x128xbf16, #tpu.memory_space<vmem>>, vector<128x128xbf16>
    %c0_10 = arith.constant 0 : index
    %c0_11 = arith.constant 0 : index
    %12 = vector.load %arg5[%c0_10, %c0_11] : memref<1x128xf32, #tpu.memory_space<vmem>>, vector<1x128xf32>
    %13 = arith.truncf %8 : vector<16x128xf32> to vector<16x128xbf16>
    %cst_12 = arith.constant dense<0.000000e+00> : vector<16x128xf32>
    %14 = tpu.matmul %13, %11, %cst_12 {dimension_numbers = #tpu.dot_dimension_numbers<[1], [0], [0], [1], [0, 0, 1, 1], [], []>} : vector<16x128xbf16>, vector<128x128xbf16>, vector<16x128xf32> -> vector<16x128xf32>
    %15 = vector.broadcast %12 : vector<1x128xf32> to vector<16x128xf32>
    %16 = arith.addf %14, %15 : vector<16x128xf32>
    %cst_13 = arith.constant 0.000000e+00 : f32
    %17 = vector.broadcast %cst_13 : f32 to vector<16x128xf32>
    %18 = arith.maximumf %16, %17 : vector<16x128xf32>
    %19 = vector.extract_strided_slice %18 {offsets = [0, 0], sizes = [16, 32], strides = [1, 1]} : vector<16x128xf32> to vector<16x32xf32>
    %c0_14 = arith.constant 0 : index
    %c0_15 = arith.constant 0 : index
    %20 = vector.load %arg9[%c0_14, %c0_15] : memref<16x32xf32, #tpu.memory_space<vmem>>, vector<16x32xf32>
    tpu.vector_store %arg9[%c0_14, %c0_15], %19 {strides = array<i32>} : memref<16x32xf32, #tpu.memory_space<vmem>>, vector<16x32xf32>,
    %c0_16 = arith.constant 0 : index
    %c0_17 = arith.constant 0 : index
    %21 = vector.load %arg6[%c0_16, %c0_17] : memref<128x128xbf16, #tpu.memory_space<vmem>>, vector<128x128xbf16>
    %c0_18 = arith.constant 0 : index
    %c0_19 = arith.constant 0 : index
    %22 = vector.load %arg7[%c0_18, %c0_19] : memref<1x128xf32, #tpu.memory_space<vmem>>, vector<1x128xf32>
    %23 = arith.truncf %18 : vector<16x128xf32> to vector<16x128xbf16>
    %cst_20 = arith.constant dense<0.000000e+00> : vector<16x128xf32>
    %24 = tpu.matmul %23, %21, %cst_20 {dimension_numbers = #tpu.dot_dimension_numbers<[1], [0], [0], [1], [0, 0, 1, 1], [], []>} : vector<16x128xbf16>, vector<128x128xbf16>, vector<16x128xf32> -> vector<16x128xf32>
    %25 = vector.broadcast %22 : vector<1x128xf32> to vector<16x128xf32>
    %26 = arith.addf %24, %25 : vector<16x128xf32>
    %27 = vector.extract_strided_slice %26 {offsets = [0, 0], sizes = [16, 8], strides = [1, 1]} : vector<16x128xf32> to vector<16x8xf32>
    %c0_21 = arith.constant 0 : index
    %c0_22 = arith.constant 0 : index
    %28 = vector.load %arg10[%c0_21, %c0_22] : memref<16x8xf32, #tpu.memory_space<vmem>>, vector<16x8xf32>
    tpu.vector_store %arg10[%c0_21, %c0_22], %27 {strides = array<i32>} : memref<16x8xf32, #tpu.memory_space<vmem>>, vector<16x8xf32>,
    return
  }
  func.func @transform_0(%arg0: i32) -> (i32, i32) {
    %c0_i32 = arith.constant 0 : i32
    %c0_i32_0 = arith.constant 0 : i32
    return %arg0, %c0_i32 : i32, i32
  }
  func.func @transform_1(%arg0: i32) -> (i32, i32) {
    %c0_i32 = arith.constant 0 : i32
    %c0_i32_0 = arith.constant 0 : i32
    %c0_i32_1 = arith.constant 0 : i32
    return %c0_i32, %c0_i32_0 : i32, i32
  }
  func.func @transform_2(%arg0: i32) -> (i32, i32) {
    %c0_i32 = arith.constant 0 : i32
    %c0_i32_0 = arith.constant 0 : i32
    %c0_i32_1 = arith.constant 0 : i32
    return %c0_i32, %c0_i32_0 : i32, i32
  }
  func.func @transform_3(%arg0: i32) -> (i32, i32) {
    %c0_i32 = arith.constant 0 : i32
    %c0_i32_0 = arith.constant 0 : i32
    %c0_i32_1 = arith.constant 0 : i32
    return %c0_i32, %c0_i32_0 : i32, i32
  }
  func.func @transform_4(%arg0: i32) -> (i32, i32) {
    %c0_i32 = arith.constant 0 : i32
    %c0_i32_0 = arith.constant 0 : i32
    %c0_i32_1 = arith.constant 0 : i32
    return %c0_i32, %c0_i32_0 : i32, i32
  }
  func.func @transform_5(%arg0: i32) -> (i32, i32) {
    %c0_i32 = arith.constant 0 : i32
    %c0_i32_0 = arith.constant 0 : i32
    %c0_i32_1 = arith.constant 0 : i32
    return %c0_i32, %c0_i32_0 : i32, i32
  }
  func.func @transform_6(%arg0: i32) -> (i32, i32) {
    %c0_i32 = arith.constant 0 : i32
    %c0_i32_0 = arith.constant 0 : i32
    %c0_i32_1 = arith.constant 0 : i32
    return %c0_i32, %c0_i32_0 : i32, i32
  }
  func.func @transform_7(%arg0: i32) -> (i32, i32) {
    %c0_i32 = arith.constant 0 : i32
    %c0_i32_0 = arith.constant 0 : i32
    return %arg0, %c0_i32 : i32, i32
  }
  func.func @transform_8(%arg0: i32) -> (i32, i32) {
    %c0_i32 = arith.constant 0 : i32
    %c0_i32_0 = arith.constant 0 : i32
    return %arg0, %c0_i32 : i32, i32
  }
  func.func @transform_9(%arg0: i32) -> (i32, i32) {
    %c0_i32 = arith.constant 0 : i32
    %c0_i32_0 = arith.constant 0 : i32
    return %arg0, %c0_i32 : i32, i32
  }
}

</mosaic_0001>

<bundles_post_ra>
// kernel: tpu_custom_call.1
= control target key start
LH: loop header
LB: loop body
LE: loop exit
PB: predicated region body
PF: predicated region fallthrough
CT: control target
= control target key end

     0   :  { %15 = vsyncpa [#allocation3], 0  ;;  %s893_s0 = inlined_call_operand.hbm [shape: f32[16,16], index: 0, kind: input, shape index: {}]   ;;  %s894_s1 = inlined_call_operand.hbm [shape: bf16[16,128], index: 1, kind: input, shape index: {}]   ;;  %s895_s2 = inlined_call_operand.vmem [shape: f32[1,128], index: 2, kind: input, shape index: {}]   ;;  %s896_s3 = inlined_call_operand.hbm [shape: bf16[128,128], index: 3, kind: input, shape index: {}]   ;;  %s897_s4 = inlined_call_operand.vmem [shape: f32[1,128], index: 4, kind: input, shape index: {}]   ;;  %s898_s5 = inlined_call_operand.hbm [shape: bf16[128,128], index: 5, kind: input, shape index: {}]   ;;  %s899_s6 = inlined_call_operand.vmem [shape: f32[1,128], index: 6, kind: input, shape index: {}]   ;;  %s900_s7 = inlined_call_operand.hbm [shape: f32[16,32], index: 7, kind: output, shape index: {0}]   ;;  %s901_s8 = inlined_call_operand.hbm [shape: f32[16,32], index: 8, kind: output, shape index: {1}]   ;;  %s902_s9 = inlined_call_operand.vmem [shape: f32[16,8], index: 9, kind: output, shape index: {2}]  }
   0x1   :  { %16 = vsyncpa [#allocation6], 0 }
   0x2   :  { %17 = vsyncpa [#allocation9], 0 }
   0x3   :  { %18 = vsyncpa [#allocation4], 0 }
   0x4   :  { %19 = vsyncpa [#allocation12], 0  ;;  %s685_s30 = smov [#allocation5]   ;;  %s543_s13 = scalar_lea.hbm %s894_s1, 128 }
   0x5   :  { %s37_s10 = sshll.u32 %s685_s30, 4  ;;  %p544_p0 = scmp.ne.s32.totalorder %s894_s1, %s543_s13  ;;  %s38_s10 = int_to_ptr.vmem [resolvable:$true] %s37_s10 }
   0x6   :  { %p547_p1 = scmp.lt.u32.totalorder %s543_s13, %s894_s1 }
   0x8   :  { %p549_p2 = pnand %p547_p1, %p544_p0 }
   0xa   :  { %552 = shalt.err (!%p549_p2)
}
   0xb   :  { %s553_s18 = scalar_lea.vmem %s38_s10, 128  ;;  %p558_p4 = scmp.lt.s32.totalorder %s38_s10, %s38_s10 }
   0xc   :  { %p554_p3 = scmp.ne.s32.totalorder %s38_s10, %s553_s18  ;;  %p559_p5 = scmp.lt.s32.totalorder %s553_s18, %s553_s18 }
   0xe   :  { %p560_p6 = por %p559_p5, %p558_p4 }
  0x10   :  { %p561_p7 = pnand %p560_p6, %p554_p3 }
  0x12   :  { %564 = shalt.err (!%p561_p7)
}
  0x13   :  { %s686_s19 = smov 64   ;;  %s687_s20 = smov 4  }
  0x14   :  { %43 = dma.hbm_to_vmem [thread:$0]  %s894_s1, 128, %s38_s10, [#allocation6], %s686_s19, %s686_s19, %s687_s20  }
  0x15   :  { %s688_s23 = smov [#allocation2]   ;;  %s565_s27 = scalar_lea.hbm %s893_s0, 256 }
  0x16   :  { %s25_s24 = sshll.u32 %s688_s23, 4  ;;  %p566_p8 = scmp.ne.s32.totalorder %s893_s0, %s565_s27  ;;  %s26_s24 = int_to_ptr.vmem [resolvable:$true] %s25_s24 }
  0x17   :  { %p569_p9 = scmp.lt.u32.totalorder %s565_s27, %s893_s0 }
  0x19   :  { %p571_p10 = pnand %p569_p9, %p566_p8 }
  0x1b   :  { %574 = shalt.err (!%p571_p10)
}
  0x1c   :  { %s575_s12 = scalar_lea.vmem %s26_s24, 256  ;;  %p580_p12 = scmp.lt.s32.totalorder %s26_s24, %s26_s24 }
  0x1d   :  { %p576_p11 = scmp.ne.s32.totalorder %s26_s24, %s575_s12  ;;  %p581_p13 = scmp.lt.s32.totalorder %s575_s12, %s575_s12 }
  0x1f   :  { %p582_p0 = por %p581_p13, %p580_p12 }
  0x21   :  { %p583_p1 = pnand %p582_p0, %p576_p11 }
  0x23   :  { %586 = shalt.err (!%p583_p1)
}
  0x24   :  { %s689_s1 = smov 128   ;;  %s690_s10 = smov 8  }
  0x25   :  { %31 = dma.hbm_to_vmem [thread:$0]  %s893_s0, 256, %s26_s24, [#allocation3], %s689_s1, %s689_s1, %s690_s10  }
  0x26   :  { %s691_s15 = smov [#allocation7]   ;;  %s692_s17 = smov [#allocation8]  }
  0x27   :  { %s51_s16 = sshll.u32 %s691_s15, 4  ;;  %s65_s18 = sshll.u32 %s692_s17, 4  ;;  %s52_s16 = int_to_ptr.vmem [resolvable:$true] %s51_s16  ;;  %s777_s18 = int_to_ptr.vmem [resolvable:$true] %s65_s18 }
  0x28   :  { %s587_s23 = scalar_lea.hbm %s896_s3, 1024 }
  0x29   :  { %p588_p2 = scmp.ne.s32.totalorder %s896_s3, %s587_s23  ;;  %p591_p3 = scmp.lt.u32.totalorder %s587_s23, %s896_s3 }
  0x2b   :  { %p593_p4 = pnand %p591_p3, %p588_p2 }
  0x2d   :  { %596 = shalt.err (!%p593_p4)
}
  0x2e   :  { %s597_s0 = scalar_lea.vmem %s52_s16, 1024  ;;  %p602_p6 = scmp.lt.s32.totalorder %s52_s16, %s52_s16 }
  0x2f   :  { %p598_p5 = scmp.ne.s32.totalorder %s52_s16, %s597_s0  ;;  %p603_p7 = scmp.lt.s32.totalorder %s597_s0, %s597_s0 }
  0x31   :  { %p604_p8 = por %p603_p7, %p602_p6 }
  0x33   :  { %p605_p9 = pnand %p604_p8, %p598_p5 }
  0x35   :  { %608 = shalt.err (!%p605_p9)
}
  0x36   :  { %57 = dma.hbm_to_vmem [thread:$0]  %s896_s3, 1024, %s52_s16, [#allocation6], %s686_s19, %s686_s19, %s687_s20  }
  0x37   :  { %s609_s12 = scalar_lea.hbm %s898_s5, 1024 }
  0x38   :  { %p610_p10 = scmp.ne.s32.totalorder %s898_s5, %s609_s12  ;;  %p613_p11 = scmp.lt.u32.totalorder %s609_s12, %s898_s5 }
  0x3a   :  { %p615_p12 = pnand %p613_p11, %p610_p10 }
  0x3c   :  { %618 = shalt.err (!%p615_p12)
}
  0x3d   :  { %s619_s21 = scalar_lea.vmem %s777_s18, 1024  ;;  %p624_p0 = scmp.lt.s32.totalorder %s777_s18, %s777_s18 }
  0x3e   :  { %p620_p13 = scmp.ne.s32.totalorder %s777_s18, %s619_s21  ;;  %p625_p1 = scmp.lt.s32.totalorder %s619_s21, %s619_s21 }
  0x40   :  { %p626_p2 = por %p625_p1, %p624_p0 }
  0x42   :  { %p627_p3 = pnand %p626_p2, %p620_p13 }
  0x44   :  { %630 = shalt.err (!%p627_p3)
}
  0x45   :  { %71 = dma.hbm_to_vmem [thread:$0]  %s898_s5, 1024, %s777_s18, [#allocation9], %s686_s19, %s686_s19, %s687_s20  }
  0x46   :  { %675 = dma.done.wait [#allocation3], 256  }
  0x47   :  { %676 = vsyncadd [#allocation3], 4294967040 }
  0x48   :  { %677 = dma.done.wait [#allocation6], 1152  }
  0x49   :  { %678 = vsyncadd [#allocation6], 4294966144 }
  0x4a   :  { %679 = dma.done.wait [#allocation9], 1024  }
  0x4b   :  { %680 = vsyncadd [#allocation9], 4294966272  ;;  %v693_v0 = vmov 0.0   ;;  %vm694_vm0 = vmmov 0   ;;  %v526_v1 = vld [vmem:[#allocation5] sm:$0xff]   ;;  %v87_v2 = vld [vmem:[#allocation2] sm:$0xff] }
  0x4c   :  { %468 = vmatprep.subr.bf16.mxu0 %v693_v0  ;;  %470 = vmatprep.mubr.msk.bf16.mxu0 %vm694_vm0, %v693_v0  ;;  %v88_v3 = vld [vmem:[#allocation2 + $0x8] sm:$0xff]  ;;  %vm105_vm1 = vcmask 130048   ;;  %v527_v5 = vld [vmem:[#allocation7] sm:$0xff]   ;;  %v528_v6 = vld [vmem:[#allocation7 + $0x8] sm:$0xff]   ;;  %vm152_vm2 = vcmask 261120   ;;  %s695_s18 = smov [#allocation10]  }
  0x4d   :  { %474 = vmatprep.subr.bf16.mxu1 %v693_v0  ;;  %490 = vmatprep.mubr.msk.bf16.mxu1 %vm694_vm0, %v693_v0  ;;  %v92_v4 = vpack.c.bf16 %v88_v3, %v87_v2  ;;  %v529_v7 = vld [vmem:[#allocation7 + $0x10] sm:$0xff]   ;;  %v530_v8 = vld [vmem:[#allocation7 + $0x18] sm:$0xff]   ;;  %v531_v9 = vld [vmem:[#allocation7 + $0x20] sm:$0xff]   ;;  %s393_s22 = sshll.u32 %s695_s18, 4  ;;  %s696_s23 = smov [#allocation11]   ;;  %s394_s22 = int_to_ptr.vmem [resolvable:$true] %s393_s22 }
  0x4e   :  { %469 = vmatpush3.bf16.msra.mxu0 %v526_v1  ;;  %475 = vmatpush3.bf16.msra.mxu1 %v527_v5  ;;  %v532_v10 = vld [vmem:[#allocation7 + $0x28] sm:$0xff]   ;;  %v533_v11 = vld [vmem:[#allocation7 + $0x30] sm:$0xff]   ;;  %v534_v12 = vld [vmem:[#allocation7 + $0x38] sm:$0xff]   ;;  %s405_s25 = sshll.u32 %s696_s23, 4  ;;  %p636_p5 = scmp.lt.s32.totalorder %s394_s22, %s394_s22  ;;  %s847_s25 = int_to_ptr.vmem [resolvable:$true] %s405_s25 }
  0x4f   :  { %494 = vmatprep.subr.bf16.mxu0 %v693_v0  ;;  %476 = vmatprep.subr.bf16.mxu1 %v693_v0  ;;  %v535_v13 = vld [vmem:[#allocation8] sm:$0xff]   ;;  %v536_v14 = vld [vmem:[#allocation8 + $0x8] sm:$0xff]   ;;  %v537_v15 = vld [vmem:[#allocation8 + $0x10] sm:$0xff]  }
  0x50   :  { %v538_v16 = vld [vmem:[#allocation8 + $0x18] sm:$0xff]   ;;  %v539_v17 = vld [vmem:[#allocation8 + $0x20] sm:$0xff]   ;;  %v540_v18 = vld [vmem:[#allocation8 + $0x28] sm:$0xff]  }
  0x51   :  { %471 = vmatmul.mubr.msk.bf16.vlgmr.msra.gmra.mrb[0].mxu0 %vm105_vm1, %v92_v4  ;;  %v427_v19 = vld [vmem:[%s895_s2] ss:$0 sm:$0xff]  ;;  %v541_v29 = vld [vmem:[#allocation8 + $0x30] sm:$0xff]   ;;  %v542_v30 = vld [vmem:[#allocation8 + $0x38] sm:$0xff]  }
  0x52   :  { %510 = vmatprep.mubr.msk.bf16.mxu0 %vm694_vm0, %v693_v0  ;;  %477 = vmatpush3.bf16.msra.mxu1 %v528_v6  ;;  %v430_v31 = vld [vmem:[%s897_s4] ss:$0 sm:$0xff]  ;;  %s631_s4 = scalar_lea.vmem %s394_s22, 256 }
  0x53   :  { %478 = vmatprep.subr.bf16.mxu1 %v693_v0  ;;  %495 = vmatpush3.bf16.msra.mxu0 %v535_v13  ;;  %p632_p4 = scmp.ne.s32.totalorder %s394_s22, %s631_s4  ;;  %p637_p6 = scmp.lt.s32.totalorder %s631_s4, %s631_s4 }
  0x54   :  { %496 = vmatprep.subr.bf16.mxu0 %v693_v0 }
  0x55   :  { %p638_p7 = por %p637_p6, %p636_p5 }
  0x56   :  { %479 = vmatpush3.bf16.msra.mxu1 %v529_v7 }
  0x57   :  { %480 = vmatprep.subr.bf16.mxu1 %v693_v0  ;;  %497 = vmatpush3.bf16.msra.mxu0 %v536_v14  ;;  %p639_p8 = pnand %p638_p7, %p632_p4 }
  0x58   :  { %498 = vmatprep.subr.bf16.mxu0 %v693_v0 }
  0x5a   :  { %481 = vmatpush3.bf16.msra.mxu1 %v530_v8 }
  0x5b   :  { %482 = vmatprep.subr.bf16.mxu1 %v693_v0  ;;  %499 = vmatpush3.bf16.msra.mxu0 %v537_v15 }
  0x5c   :  { %500 = vmatprep.subr.bf16.mxu0 %v693_v0 }
  0x5e   :  { %483 = vmatpush3.bf16.msra.mxu1 %v531_v9 }
  0x5f   :  { %484 = vmatprep.subr.bf16.mxu1 %v693_v0  ;;  %501 = vmatpush3.bf16.msra.mxu0 %v538_v16 }
  0x60   :  { %502 = vmatprep.subr.bf16.mxu0 %v693_v0 }
  0x62   :  { %485 = vmatpush3.bf16.msra.mxu1 %v532_v10 }
  0x63   :  { %486 = vmatprep.subr.bf16.mxu1 %v693_v0  ;;  %503 = vmatpush3.bf16.msra.mxu0 %v539_v17 }
  0x64   :  { %504 = vmatprep.subr.bf16.mxu0 %v693_v0 }
  0x66   :  { %487 = vmatpush3.bf16.msra.mxu1 %v533_v11 }
  0x67   :  { %488 = vmatprep.subr.bf16.mxu1 %v693_v0  ;;  %505 = vmatpush3.bf16.msra.mxu0 %v540_v18 }
  0x68   :  { %506 = vmatprep.subr.bf16.mxu0 %v693_v0 }
  0x6a   :  { %489 = vmatpush3.bf16.msra.mxu1 %v534_v12 }
  0x6b   :  { %507 = vmatpush3.bf16.msra.mxu0 %v541_v29 }
  0x6c   :  { %508 = vmatprep.subr.bf16.mxu0 %v693_v0 }
  0x6f   :  { %509 = vmatpush3.bf16.msra.mxu0 %v542_v30 }
 0x124   :  { %v143_v20 = vpop.f32.mrb[0].mxu0 }
 0x125   :  { %v144_v21 = vadd.f32 %v427_v19, %v143_v20  ;;  %v472_v22 = vpop.f32.mrb[1].mxu0 }
 0x126   :  { %v146_v23 = vpop.f32.mrb[2].mxu0 }
 0x127   :  { %v150_v24 = vmax.f32 %v144_v21, 0.0  ;;  %v147_v25 = vadd.f32 %v427_v19, %v146_v23  ;;  %v473_v26 = vpop.f32.mrb[3].mxu0 }
 0x129   :  { %v151_v27 = vmax.f32 %v147_v25, 0.0  ;;  %153 = vst.msk [vmem:[#allocation10] sm:$0xff] %vm152_vm2, %v150_v24 }
 0x12b   :  { %v172_v28 = vpack.c.bf16 %v151_v27, %v150_v24  ;;  %154 = vst.msk [vmem:[#allocation10 + $0x8] sm:$0xff] %vm152_vm2, %v151_v27 }
 0x12d   :  { %491 = vmatmul.mubr.bf16.vlgmr.msra.gmra.mrb[0].mxu1 %v172_v28 }
 0x200   :  { %v261_v32 = vpop.f32.mrb[0].mxu1 }
 0x201   :  { %v262_v33 = vadd.f32 %v430_v31, %v261_v32  ;;  %v492_v34 = vpop.f32.mrb[1].mxu1 }
 0x202   :  { %v264_v35 = vpop.f32.mrb[2].mxu1 }
 0x203   :  { %v268_v36 = vmax.f32 %v262_v33, 0.0  ;;  %v265_v37 = vadd.f32 %v430_v31, %v264_v35  ;;  %v493_v38 = vpop.f32.mrb[3].mxu1 }
 0x205   :  { %v269_v39 = vmax.f32 %v265_v37, 0.0  ;;  %270 = vst.msk [vmem:[#allocation11] sm:$0xff] %vm152_vm2, %v268_v36 }
 0x207   :  { %v289_v40 = vpack.c.bf16 %v269_v39, %v268_v36  ;;  %271 = vst.msk [vmem:[#allocation11 + $0x8] sm:$0xff] %vm152_vm2, %v269_v39 }
 0x209   :  { %511 = vmatmul.mubr.bf16.vlgmr.msra.gmra.mrb[4].mxu0 %v289_v40 }
 0x20a   :  { %642 = shalt.err (!%p639_p8)
}
 0x20b   :  { %s643_s28 = scalar_lea.hbm %s900_s7, 256 }
 0x20c   :  { %p644_p9 = scmp.ne.s32.totalorder %s900_s7, %s643_s28  ;;  %p647_p10 = scmp.lt.u32.totalorder %s643_s28, %s900_s7 }
 0x20e   :  { %p649_p11 = pnand %p647_p10, %p644_p9 }
 0x210   :  { %652 = shalt.err (!%p649_p11)
}
 0x211   :  { %399 = dma.vmem_to_hbm [thread:$0]  %s394_s22, 256, %s900_s7, [#allocation4], %s689_s1, %s689_s1, %s690_s10  }
 0x212   :  { %s653_s13 = scalar_lea.vmem %s847_s25, 256  ;;  %p658_p13 = scmp.lt.s32.totalorder %s847_s25, %s847_s25 }
 0x213   :  { %p654_p12 = scmp.ne.s32.totalorder %s847_s25, %s653_s13  ;;  %p659_p0 = scmp.lt.s32.totalorder %s653_s13, %s653_s13 }
 0x215   :  { %p660_p1 = por %p659_p0, %p658_p13 }
 0x217   :  { %p661_p2 = pnand %p660_p1, %p654_p12 }
 0x219   :  { %664 = shalt.err (!%p661_p2)
}
 0x21a   :  { %s665_s17 = scalar_lea.hbm %s901_s8, 256 }
 0x21b   :  { %p666_p3 = scmp.ne.s32.totalorder %s901_s8, %s665_s17  ;;  %p669_p4 = scmp.lt.u32.totalorder %s665_s17, %s901_s8 }
 0x21d   :  { %p671_p5 = pnand %p669_p4, %p666_p3 }
 0x21f   :  { %674 = shalt.err (!%p671_p5)
}
 0x220   :  { %411 = dma.vmem_to_hbm [thread:$0]  %s847_s25, 256, %s901_s8, [#allocation12], %s689_s1, %s689_s1, %s690_s10   ;;  %vm385_vm3 = vcmask 64512  }
 0x221   :  { %v439_v41 = vld [vmem:[%s899_s6] ss:$0 sm:$0xff] }
 0x2dc   :  { %v378_v42 = vpop.f32.mrb[4].mxu0 }
 0x2dd   :  { %v379_v43 = vadd.f32 %v439_v41, %v378_v42  ;;  %v512_v44 = vpop.f32.mrb[5].mxu0 }
 0x2de   :  { %v381_v45 = vpop.f32.mrb[6].mxu0 }
 0x2df   :  { %386 = vst.msk [vmem:[%s902_s9] sm:$0xff] %vm385_vm3, %v379_v43  ;;  %v382_v46 = vadd.f32 %v439_v41, %v381_v45  ;;  %v513_v47 = vpop.f32.mrb[7].mxu0 }
 0x2e1   :  { %387 = vst.msk [vmem:[%s902_s9 + $0x8] sm:$0xff] %vm385_vm3, %v382_v46 }
 0x2e2   :  { %681 = dma.done.wait [#allocation4], 256  }
 0x2e3   :  { %682 = vsyncadd [#allocation4], 4294967040 }
 0x2e4   :  { %683 = dma.done.wait [#allocation12], 256  }
 0x2e5   :  { %684 = vsyncadd [#allocation12], 4294967040 }
 0x2e6   :  { %422 = vsyncpa [#allocation3], 1 }
 0x2e7   :  { %423 = vsyncpa [#allocation6], 1 }
 0x2e8   :  { %424 = vsyncpa [#allocation9], 1 }
 0x2e9   :  { %425 = vsyncpa [#allocation4], 1 }
 0x2ea   :  { %426 = vsyncpa [#allocation12], 1 }

</bundles_post_ra>
